<compile_context>
chip_gen: v6e
topology: v6e:2x2x1
jax: 0.10.0
libtpu: 0.0.40
codegen_flags: <defaults>
</compile_context>

<pallas_src>
import jax
import jax.numpy as jnp
from jax import lax
from jax.experimental import pallas as pl
from jax.experimental.pallas import tpu as pltpu

NUM_LATENTS = 8      # module default is 32; small shape for the demo
LATENT_DIM  = 128
NUM_CLASSES = 1000
NUM_CUTOUTS = 16     # module default is 128; small shape for the demo
EMBED_DIM   = 512
LOSS_COEF   = 100.0
THRESH_LAT  = 1.0    # registered buffer torch.tensor(1)
_COS_EPS    = 1e-8   # torch.cosine_similarity eps


# ---------------------------------------------------------------------------
# Fused kernel: Latents sigmoid + the three BigSleep losses in one invocation.
# ---------------------------------------------------------------------------
def _imagine_losses_kernel(normu_ref, cls_logits_ref, text_ref, img_ref, out_ref):
    # --- Latents.forward(): classes = sigmoid(cls)   (max_classes=None) ----
    cls = jax.nn.sigmoid(cls_logits_ref[...].astype(jnp.float32))      # (N, 1000)

    # --- lat_loss -----------------------------------------------------------
    lat = normu_ref[...].astype(jnp.float32)                           # (N, 128)
    n_lat, d_lat = lat.shape
    inv_n = 1.0 / n_lat

    row_mean = jnp.mean(lat, axis=1, keepdims=True)                    # (N, 1)
    diffs = lat - row_mean
    # torch.std default is unbiased (ddof=1)
    row_var_unb = jnp.sum(diffs * diffs, axis=1, keepdims=True) * (1.0 / (d_lat - 1))
    row_std = jnp.sqrt(row_var_unb)
    term1 = jnp.sum(jnp.abs(1.0 - row_std)) * inv_n
    term2 = jnp.abs(jnp.mean(lat))
    term3 = 4.0 * jnp.maximum(jnp.mean(lat * lat), THRESH_LAT)
    lat_loss = term1 + term2 + term3

    # skew / kurtosis: the PyTorch `for array in latents` loop leaves only the
    # LAST row's values alive.
    last = lat[n_lat - 1:n_lat, :]                                     # (1, 128)
    m = jnp.mean(last)
    d = last - m
    var = jnp.mean(d * d)                                              # biased
    z = d * lax.rsqrt(var)            # EUP rsqrt instead of VALU divide
    z2 = z * z                        # explicit multiplies, no pow lowering
    z3 = z2 * z
    z4 = z2 * z2
    skew = jnp.mean(z3)
    kurt = jnp.mean(z4) - 3.0
    lat_loss = lat_loss + (jnp.abs(kurt) + jnp.abs(skew)) * inv_n

    # --- cls_loss -------------------------------------------------------------
    # topk(k=999, largest=False) of 1000 drops exactly one occurrence of the
    # per-row max (correct even with ties), so
    #   ((50*x)^2).mean() == 2500 * sum(sum(x^2) - max(x)^2) / (N * 999)
    n_cls = cls.shape[1]
    ss = jnp.sum(cls * cls, axis=1, keepdims=True)                     # (N, 1)
    mx = jnp.max(cls, axis=1, keepdims=True)                           # (N, 1)
    cls_loss = (2500.0 / (n_lat * (n_cls - 1))) * jnp.sum(ss - mx * mx)

    # --- sim_loss -------------------------------------------------------------
    t = text_ref[...].astype(jnp.float32)                              # (1, E)
    im = img_ref[...].astype(jnp.float32)                              # (C, E)
    # clamp(norm, eps) == sqrt(max(norm^2, eps^2)); fold both norms into a
    # single EUP rsqrt, no vector divide.
    t_sq = jnp.maximum(jnp.sum(t * t), _COS_EPS * _COS_EPS)            # scalar
    im_sq = jnp.maximum(jnp.sum(im * im, axis=1, keepdims=True),
                        _COS_EPS * _COS_EPS)                           # (C, 1)
    dots = jnp.sum(im * t, axis=1, keepdims=True)                      # (C, 1)
    cos = dots * lax.rsqrt(t_sq * im_sq)
    sim_loss = -LOSS_COEF * jnp.mean(cos)

    out_ref[0] = lat_loss
    out_ref[1] = cls_loss
    out_ref[2] = sim_loss


# Tiny, accurate cost hint so XLA schedules this as the cheap op it is.
_COST = pl.CostEstimate(
    flops=60_000,
    transcendentals=8_300,   # 8x1000 sigmoid + a handful of sqrt/rsqrt
    bytes_accessed=4 * (NUM_LATENTS * LATENT_DIM
                        + NUM_LATENTS * NUM_CLASSES
                        + EMBED_DIM
                        + NUM_CUTOUTS * EMBED_DIM) + 12,
)


def big_sleep_losses(normu, cls_logits, text_embed, image_embed):
    """Single fused pallas_call.

    Returns a length-3 f32 array [lat_loss, cls_loss, sim_loss] (the training
    step sums the losses anyway, so no per-loss slice ops are dispatched).
    """
    return pl.pallas_call(
        _imagine_losses_kernel,
        out_shape=jax.ShapeDtypeStruct((3,), jnp.float32),
        in_specs=[pl.BlockSpec(memory_space=pltpu.MemorySpace.VMEM)] * 4,
        out_specs=pl.BlockSpec(memory_space=pltpu.MemorySpace.SMEM),
        cost_estimate=_COST,
    )(normu, cls_logits, text_embed, image_embed)


@jax.jit
def imagine_forward(normu, cls_logits, text_embed, image_embed):
    # TODO(synk): BigGAN-deep generator, random cutouts + F.interpolate, and
    # the CLIP image/text encoders ("perceptor") are external pretrained /
    # stochastic machinery; deterministic stand-in embeddings are used here.
    return big_sleep_losses(normu, cls_logits, text_embed, image_embed)


def _reference(normu, cls_logits, text_embed, image_embed):
    """Plain-JAX reference for correctness checking."""
    lat = normu
    n, _ = lat.shape
    classes = jax.nn.sigmoid(cls_logits)
    row_std = jnp.std(lat, axis=1, ddof=1)
    lat_loss = (jnp.mean(jnp.abs(1.0 - row_std)) + jnp.abs(jnp.mean(lat))
                + 4.0 * jnp.maximum(jnp.mean(lat ** 2), THRESH_LAT))
    last = lat[-1]
    m = jnp.mean(last)
    dd = last - m
    z = dd / jnp.sqrt(jnp.mean(dd ** 2))
    skew = jnp.mean(z ** 3)
    kurt = jnp.mean(z ** 4) - 3.0
    lat_loss = lat_loss + jnp.abs(kurt) / n + jnp.abs(skew) / n
    smallest = jnp.sort(classes, axis=1)[:, :-1]                  # 999 smallest
    cls_loss = jnp.mean((50.0 * smallest) ** 2)
    t = text_embed / jnp.linalg.norm(text_embed, axis=-1, keepdims=True)
    im = image_embed / jnp.linalg.norm(image_embed, axis=-1, keepdims=True)
    sim_loss = -LOSS_COEF * jnp.mean(jnp.sum(t * im, axis=-1))
    return lat_loss, cls_loss, sim_loss


if __name__ == "__main__":
    key = jax.random.PRNGKey(0)
    k1, k2, k3, k4 = jax.random.split(key, 4)

    # Latents parameters (deterministic init matching the module's __init__):
    #   normu ~ N(0, 1)        shape (num_latents, 128)
    #   cls   ~ N(-3.9, 0.3)   shape (num_latents, 1000)
    normu = jax.random.normal(k1, (NUM_LATENTS, LATENT_DIM), dtype=jnp.float32)
    cls_logits = -3.9 + 0.3 * jax.random.normal(
        k2, (NUM_LATENTS, NUM_CLASSES), dtype=jnp.float32)

    # Stand-ins for perceptor.encode_text(text) / perceptor.encode_image(cutouts)
    text_embed = jax.random.normal(k3, (1, EMBED_DIM), dtype=jnp.float32)
    image_embed = jax.random.normal(k4, (NUM_CUTOUTS, EMBED_DIM), dtype=jnp.float32)

    losses = jax.block_until_ready(
        imagine_forward(normu, cls_logits, text_embed, image_embed))
    # single host transfer; no extra device-side slice ops per step
    lat_loss, cls_loss, sim_loss = jax.device_get(losses)

    ref_lat, ref_cls, ref_sim = _reference(normu, cls_logits, text_embed, image_embed)
    assert jnp.allclose(lat_loss, ref_lat, rtol=1e-4, atol=1e-4), (lat_loss, ref_lat)
    assert jnp.allclose(cls_loss, ref_cls, rtol=1e-4, atol=1e-4), (cls_loss, ref_cls)
    # sim_loss goes through EUP rsqrt (may be an approximate pipe on TPU);
    # allow a slightly looser tolerance on the 100x-scaled cosine mean.
    assert jnp.allclose(sim_loss, ref_sim, rtol=1e-3, atol=2e-3), (sim_loss, ref_sim)

    print("KERNEL_OK")
</pallas_src>

<mosaic_0001>
module attributes {stable_mosaic.version = 11 : i64} {
  func.func @_imagine_losses_kernel(%arg0: memref<8x128xf32, #tpu.memory_space<vmem>>, %arg1: memref<8x1000xf32, #tpu.memory_space<vmem>>, %arg2: memref<1x512xf32, #tpu.memory_space<vmem>>, %arg3: memref<16x512xf32, #tpu.memory_space<vmem>>, %arg4: memref<3xf32, #tpu.memory_space<smem>>) attributes {dimension_semantics = [], scalar_prefetch = 0 : i64, scratch_operands = 0 : i64, tpu.core_type = #tpu.core_type<tc>} {
    %c0 = arith.constant 0 : index
    %c0_0 = arith.constant 0 : index
    %0 = vector.load %arg1[%c0, %c0_0] : memref<8x1000xf32, #tpu.memory_space<vmem>>, vector<8x1000xf32>
    %1 = arith.negf %0 : vector<8x1000xf32>
    %2 = math.exp %1 : vector<8x1000xf32>
    %cst = arith.constant 1.000000e+00 : f32
    %3 = vector.broadcast %cst : f32 to vector<8x1000xf32>
    %4 = arith.addf %3, %2 : vector<8x1000xf32>
    %5 = arith.divf %3, %4 : vector<8x1000xf32>
    %c0_1 = arith.constant 0 : index
    %c0_2 = arith.constant 0 : index
    %6 = vector.load %arg0[%c0_1, %c0_2] : memref<8x128xf32, #tpu.memory_space<vmem>>, vector<8x128xf32>
    %cst_3 = arith.constant dense<0.000000e+00> : vector<8xf32>
    %7 = vector.multi_reduction <add>, %6, %cst_3 [1] : vector<8x128xf32> to vector<8xf32>
    %8 = vector.shape_cast %7 : vector<8xf32> to vector<8x1xf32>
    %cst_4 = arith.constant 1.280000e+02 : f32
    %9 = vector.broadcast %cst_4 : f32 to vector<8x1xf32>
    %10 = arith.divf %8, %9 : vector<8x1xf32>
    %11 = vector.broadcast %10 : vector<8x1xf32> to vector<8x128xf32>
    %12 = arith.subf %6, %11 : vector<8x128xf32>
    %13 = arith.mulf %12, %12 : vector<8x128xf32>
    %cst_5 = arith.constant dense<0.000000e+00> : vector<8xf32>
    %14 = vector.multi_reduction <add>, %13, %cst_5 [1] : vector<8x128xf32> to vector<8xf32>
    %15 = vector.shape_cast %14 : vector<8xf32> to vector<8x1xf32>
    %cst_6 = arith.constant 0.00787401571 : f32
    %16 = vector.broadcast %cst_6 : f32 to vector<8x1xf32>
    %17 = arith.mulf %15, %16 : vector<8x1xf32>
    %18 = math.sqrt %17 : vector<8x1xf32>
    %cst_7 = arith.constant 1.000000e+00 : f32
    %19 = vector.broadcast %cst_7 : f32 to vector<8x1xf32>
    %20 = arith.subf %19, %18 : vector<8x1xf32>
    %21 = math.absf %20 : vector<8x1xf32>
    %22 = vector.shape_cast %21 : vector<8x1xf32> to vector<1x8x1xf32>
    %cst_8 = arith.constant dense<0.000000e+00> : vector<1xf32>
    %23 = vector.multi_reduction <add>, %22, %cst_8 [1, 2] : vector<1x8x1xf32> to vector<1xf32>
    %24 = vector.shape_cast %23 : vector<1xf32> to vector<1x1x1xf32>
    %25 = vector.extract %24[0, 0, 0] : f32 from vector<1x1x1xf32>
    %cst_9 = arith.constant 1.250000e-01 : f32
    %26 = arith.mulf %25, %cst_9 : f32
    %27 = vector.shape_cast %6 : vector<8x128xf32> to vector<1x8x128xf32>
    %cst_10 = arith.constant dense<0.000000e+00> : vector<1xf32>
    %28 = vector.multi_reduction <add>, %27, %cst_10 [1, 2] : vector<1x8x128xf32> to vector<1xf32>
    %29 = vector.shape_cast %28 : vector<1xf32> to vector<1x1x1xf32>
    %30 = vector.extract %29[0, 0, 0] : f32 from vector<1x1x1xf32>
    %cst_11 = arith.constant 1.024000e+03 : f32
    %31 = arith.divf %30, %cst_11 : f32
    %32 = math.absf %31 : f32
    %33 = arith.mulf %6, %6 : vector<8x128xf32>
    %34 = vector.shape_cast %33 : vector<8x128xf32> to vector<1x8x128xf32>
    %cst_12 = arith.constant dense<0.000000e+00> : vector<1xf32>
    %35 = vector.multi_reduction <add>, %34, %cst_12 [1, 2] : vector<1x8x128xf32> to vector<1xf32>
    %36 = vector.shape_cast %35 : vector<1xf32> to vector<1x1x1xf32>
    %37 = vector.extract %36[0, 0, 0] : f32 from vector<1x1x1xf32>
    %cst_13 = arith.constant 1.024000e+03 : f32
    %38 = arith.divf %37, %cst_13 : f32
    %cst_14 = arith.constant 1.000000e+00 : f32
    %39 = arith.maximumf %38, %cst_14 : f32
    %cst_15 = arith.constant 4.000000e+00 : f32
    %40 = arith.mulf %cst_15, %39 : f32
    %41 = arith.addf %26, %32 : f32
    %42 = arith.addf %41, %40 : f32
    %43 = vector.extract_strided_slice %6 {offsets = [7, 0], sizes = [1, 128], strides = [1, 1]} : vector<8x128xf32> to vector<1x128xf32>
    %44 = vector.shape_cast %43 : vector<1x128xf32> to vector<1x1x128xf32>
    %cst_16 = arith.constant dense<0.000000e+00> : vector<1xf32>
    %45 = vector.multi_reduction <add>, %44, %cst_16 [1, 2] : vector<1x1x128xf32> to vector<1xf32>
    %46 = vector.shape_cast %45 : vector<1xf32> to vector<1x1x1xf32>
    %47 = vector.extract %46[0, 0, 0] : f32 from vector<1x1x1xf32>
    %cst_17 = arith.constant 1.280000e+02 : f32
    %48 = arith.divf %47, %cst_17 : f32
    %49 = vector.broadcast %48 : f32 to vector<1x128xf32>
    %50 = arith.subf %43, %49 : vector<1x128xf32>
    %51 = arith.mulf %50, %50 : vector<1x128xf32>
    %52 = vector.shape_cast %51 : vector<1x128xf32> to vector<1x1x128xf32>
    %cst_18 = arith.constant dense<0.000000e+00> : vector<1xf32>
    %53 = vector.multi_reduction <add>, %52, %cst_18 [1, 2] : vector<1x1x128xf32> to vector<1xf32>
    %54 = vector.shape_cast %53 : vector<1xf32> to vector<1x1x1xf32>
    %55 = vector.extract %54[0, 0, 0] : f32 from vector<1x1x1xf32>
    %cst_19 = arith.constant 1.280000e+02 : f32
    %56 = arith.divf %55, %cst_19 : f32
    %57 = math.rsqrt %56 : f32
    %58 = vector.broadcast %57 : f32 to vector<1x128xf32>
    %59 = arith.mulf %50, %58 : vector<1x128xf32>
    %60 = arith.mulf %59, %59 : vector<1x128xf32>
    %61 = arith.mulf %60, %59 : vector<1x128xf32>
    %62 = arith.mulf %60, %60 : vector<1x128xf32>
    %63 = vector.shape_cast %61 : vector<1x128xf32> to vector<1x1x128xf32>
    %cst_20 = arith.constant dense<0.000000e+00> : vector<1xf32>
    %64 = vector.multi_reduction <add>, %63, %cst_20 [1, 2] : vector<1x1x128xf32> to vector<1xf32>
    %65 = vector.shape_cast %64 : vector<1xf32> to vector<1x1x1xf32>
    %66 = vector.extract %65[0, 0, 0] : f32 from vector<1x1x1xf32>
    %cst_21 = arith.constant 1.280000e+02 : f32
    %67 = arith.divf %66, %cst_21 : f32
    %68 = vector.shape_cast %62 : vector<1x128xf32> to vector<1x1x128xf32>
    %cst_22 = arith.constant dense<0.000000e+00> : vector<1xf32>
    %69 = vector.multi_reduction <add>, %68, %cst_22 [1, 2] : vector<1x1x128xf32> to vector<1xf32>
    %70 = vector.shape_cast %69 : vector<1xf32> to vector<1x1x1xf32>
    %71 = vector.extract %70[0, 0, 0] : f32 from vector<1x1x1xf32>
    %cst_23 = arith.constant 1.280000e+02 : f32
    %72 = arith.divf %71, %cst_23 : f32
    %cst_24 = arith.constant 3.000000e+00 : f32
    %73 = arith.subf %72, %cst_24 : f32
    %74 = math.absf %73 : f32
    %75 = math.absf %67 : f32
    %76 = arith.addf %74, %75 : f32
    %cst_25 = arith.constant 1.250000e-01 : f32
    %77 = arith.mulf %76, %cst_25 : f32
    %78 = arith.addf %42, %77 : f32
    %79 = arith.mulf %5, %5 : vector<8x1000xf32>
    %cst_26 = arith.constant dense<0.000000e+00> : vector<8xf32>
    %80 = vector.multi_reduction <add>, %79, %cst_26 [1] : vector<8x1000xf32> to vector<8xf32>
    %81 = vector.shape_cast %80 : vector<8xf32> to vector<8x1xf32>
    %cst_27 = arith.constant dense<0xFF800000> : vector<8xf32>
    %82 = vector.multi_reduction <maximumf>, %5, %cst_27 [1] : vector<8x1000xf32> to vector<8xf32>
    %83 = vector.shape_cast %82 : vector<8xf32> to vector<8x1xf32>
    %84 = arith.mulf %83, %83 : vector<8x1xf32>
    %85 = arith.subf %81, %84 : vector<8x1xf32>
    %86 = vector.shape_cast %85 : vector<8x1xf32> to vector<1x8x1xf32>
    %cst_28 = arith.constant dense<0.000000e+00> : vector<1xf32>
    %87 = vector.multi_reduction <add>, %86, %cst_28 [1, 2] : vector<1x8x1xf32> to vector<1xf32>
    %88 = vector.shape_cast %87 : vector<1xf32> to vector<1x1x1xf32>
    %89 = vector.extract %88[0, 0, 0] : f32 from vector<1x1x1xf32>
    %cst_29 = arith.constant 0.312812805 : f32
    %90 = arith.mulf %cst_29, %89 : f32
    %c0_30 = arith.constant 0 : index
    %c0_31 = arith.constant 0 : index
    %91 = vector.load %arg2[%c0_30, %c0_31] : memref<1x512xf32, #tpu.memory_space<vmem>>, vector<1x512xf32>
    %c0_32 = arith.constant 0 : index
    %c0_33 = arith.constant 0 : index
    %92 = vector.load %arg3[%c0_32, %c0_33] : memref<16x512xf32, #tpu.memory_space<vmem>>, vector<16x512xf32>
    %93 = arith.mulf %91, %91 : vector<1x512xf32>
    %94 = vector.shape_cast %93 : vector<1x512xf32> to vector<1x1x512xf32>
    %cst_34 = arith.constant dense<0.000000e+00> : vector<1xf32>
    %95 = vector.multi_reduction <add>, %94, %cst_34 [1, 2] : vector<1x1x512xf32> to vector<1xf32>
    %96 = vector.shape_cast %95 : vector<1xf32> to vector<1x1x1xf32>
    %97 = vector.extract %96[0, 0, 0] : f32 from vector<1x1x1xf32>
    %cst_35 = arith.constant 1.000000e-16 : f32
    %98 = arith.maximumf %97, %cst_35 : f32
    %99 = arith.mulf %92, %92 : vector<16x512xf32>
    %cst_36 = arith.constant dense<0.000000e+00> : vector<16xf32>
    %100 = vector.multi_reduction <add>, %99, %cst_36 [1] : vector<16x512xf32> to vector<16xf32>
    %101 = vector.shape_cast %100 : vector<16xf32> to vector<16x1xf32>
    %cst_37 = arith.constant 1.000000e-16 : f32
    %102 = vector.broadcast %cst_37 : f32 to vector<16x1xf32>
    %103 = arith.maximumf %101, %102 : vector<16x1xf32>
    %104 = vector.broadcast %91 : vector<1x512xf32> to vector<16x512xf32>
    %105 = arith.mulf %92, %104 : vector<16x512xf32>
    %cst_38 = arith.constant dense<0.000000e+00> : vector<16xf32>
    %106 = vector.multi_reduction <add>, %105, %cst_38 [1] : vector<16x512xf32> to vector<16xf32>
    %107 = vector.shape_cast %106 : vector<16xf32> to vector<16x1xf32>
    %108 = vector.broadcast %98 : f32 to vector<16x1xf32>
    %109 = arith.mulf %108, %103 : vector<16x1xf32>
    %110 = math.rsqrt %109 : vector<16x1xf32>
    %111 = arith.mulf %107, %110 : vector<16x1xf32>
    %112 = vector.shape_cast %111 : vector<16x1xf32> to vector<1x16x1xf32>
    %cst_39 = arith.constant dense<0.000000e+00> : vector<1xf32>
    %113 = vector.multi_reduction <add>, %112, %cst_39 [1, 2] : vector<1x16x1xf32> to vector<1xf32>
    %114 = vector.shape_cast %113 : vector<1xf32> to vector<1x1x1xf32>
    %115 = vector.extract %114[0, 0, 0] : f32 from vector<1x1x1xf32>
    %cst_40 = arith.constant 1.600000e+01 : f32
    %116 = arith.divf %115, %cst_40 : f32
    %cst_41 = arith.constant -1.000000e+02 : f32
    %117 = arith.mulf %cst_41, %116 : f32
    %c0_42 = arith.constant 0 : index
    %118 = memref.load %arg4[%c0_42] : memref<3xf32, #tpu.memory_space<smem>>
    memref.store %78, %arg4[%c0_42] : memref<3xf32, #tpu.memory_space<smem>>
    %c1 = arith.constant 1 : index
    %119 = memref.load %arg4[%c1] : memref<3xf32, #tpu.memory_space<smem>>
    memref.store %90, %arg4[%c1] : memref<3xf32, #tpu.memory_space<smem>>
    %c2 = arith.constant 2 : index
    %120 = memref.load %arg4[%c2] : memref<3xf32, #tpu.memory_space<smem>>
    memref.store %117, %arg4[%c2] : memref<3xf32, #tpu.memory_space<smem>>
    return
  }
}

</mosaic_0001>

<bundles_post_ra>
// kernel: imagine_forward.1
= control target key start
LH: loop header
LB: loop body
LE: loop exit
PB: predicated region body
PF: predicated region fallthrough
CT: control target
= control target key end

     0   :  { %9 = vsyncpa [#allocation3], 0  ;;  %s713_s0 = inlined_call_operand.hbm [shape: f32[8,128], index: 0, kind: input, shape index: {}]   ;;  %s714_s1 = inlined_call_operand.hbm [shape: f32[8,1000], index: 1, kind: input, shape index: {}]   ;;  %s715_s2 = inlined_call_operand.hbm [shape: f32[1,512], index: 2, kind: input, shape index: {}]   ;;  %s716_s3 = inlined_call_operand.hbm [shape: f32[16,512], index: 3, kind: input, shape index: {}]   ;;  %s717_s4 = inlined_call_operand.hbm [shape: f32[3], index: 4, kind: output, shape index: {}]  }
   0x1   :  { %10 = vsyncpa [#allocation6], 0 }
   0x2   :  { %11 = vsyncpa [#allocation9], 0 }
   0x3   :  { %12 = vsyncpa [#allocation4], 0  ;;  %s634_s15 = smov [#allocation5]   ;;  %s635_s17 = smov [#allocation2]  }
   0x4   :  { %s29_s16 = sshll.u32 %s634_s15, 4  ;;  %s19_s18 = sshll.u32 %s635_s17, 4  ;;  %s30_s16 = int_to_ptr.vmem [resolvable:$true] %s29_s16  ;;  %s20_s18 = int_to_ptr.vmem [resolvable:$true] %s19_s18 }
   0x5   :  { %s546_s19 = scalar_lea.vmem %s30_s16, 1024  ;;  %p551_p1 = scmp.lt.s32.totalorder %s30_s16, %s30_s16 }
   0x6   :  { %p547_p0 = scmp.ne.s32.totalorder %s30_s16, %s546_s19  ;;  %p552_p2 = scmp.lt.s32.totalorder %s546_s19, %s546_s19 }
   0x8   :  { %p553_p3 = por %p552_p2, %p551_p1 }
   0xa   :  { %p554_p4 = pnand %p553_p3, %p547_p0 }
   0xc   :  { %557 = shalt.err (!%p554_p4)
}
   0xd   :  { %32 = dma.hbm_to_vmem [thread:$0]  %s714_s1, 1024, %s30_s16, [#allocation6]  }
   0xe   :  { %s566_s22 = scalar_lea.vmem %s20_s18, 128  ;;  %p571_p6 = scmp.lt.s32.totalorder %s20_s18, %s20_s18 }
   0xf   :  { %p567_p5 = scmp.ne.s32.totalorder %s20_s18, %s566_s22  ;;  %p572_p7 = scmp.lt.s32.totalorder %s566_s22, %s566_s22 }
  0x11   :  { %p573_p8 = por %p572_p7, %p571_p6 }
  0x13   :  { %p574_p9 = pnand %p573_p8, %p567_p5 }
  0x15   :  { %577 = shalt.err (!%p574_p9)
}
  0x16   :  { %22 = dma.hbm_to_vmem [thread:$0]  %s713_s0, 128, %s20_s18, [#allocation3]  }
  0x17   :  { %s636_s25 = smov [#allocation7]   ;;  %s637_s27 = smov [#allocation8]  }
  0x18   :  { %s39_s26 = sshll.u32 %s636_s25, 4  ;;  %s48_s28 = sshll.u32 %s637_s27, 4  ;;  %s40_s26 = int_to_ptr.vmem [resolvable:$true] %s39_s26  ;;  %s49_s28 = int_to_ptr.vmem [resolvable:$true] %s48_s28 }
  0x19   :  { %s586_s29 = scalar_lea.vmem %s40_s26, 64  ;;  %p591_p11 = scmp.lt.s32.totalorder %s40_s26, %s40_s26 }
  0x1a   :  { %p587_p10 = scmp.ne.s32.totalorder %s40_s26, %s586_s29  ;;  %p592_p12 = scmp.lt.s32.totalorder %s586_s29, %s586_s29 }
  0x1c   :  { %p593_p13 = por %p592_p12, %p591_p11 }
  0x1e   :  { %p594_p0 = pnand %p593_p13, %p587_p10 }
  0x20   :  { %597 = shalt.err (!%p594_p0)
}
  0x21   :  { %42 = dma.hbm_to_vmem [thread:$0]  %s715_s2, 64, %s40_s26, [#allocation6]  }
  0x22   :  { %s606_s5 = scalar_lea.vmem %s49_s28, 1024  ;;  %p611_p2 = scmp.lt.s32.totalorder %s49_s28, %s49_s28 }
  0x23   :  { %p607_p1 = scmp.ne.s32.totalorder %s49_s28, %s606_s5  ;;  %p612_p3 = scmp.lt.s32.totalorder %s606_s5, %s606_s5 }
  0x25   :  { %p613_p4 = por %p612_p3, %p611_p2 }
  0x27   :  { %p614_p5 = pnand %p613_p4, %p607_p1 }
  0x29   :  { %617 = shalt.err (!%p614_p5)
}
  0x2a   :  { %s638_s0 = smov 512   ;;  %s639_s6 = smov 32  }
  0x2b   :  { %54 = dma.hbm_to_vmem [thread:$0]  %s716_s3, 1024, %s49_s28, [#allocation9], %s638_s0, %s638_s0, %s639_s6  }
  0x2c   :  { %626 = dma.done.wait [#allocation3], 128  }
  0x2d   :  { %627 = vsyncadd [#allocation3], 4294967168 }
  0x2e   :  { %628 = dma.done.wait [#allocation6], 1088  }
  0x2f   :  { %629 = vsyncadd [#allocation6], 4294966208 }
  0x30   :  { %630 = dma.done.wait [#allocation9], 1024  }
  0x31   :  { %631 = vsyncadd [#allocation9], 4294966272  ;;  %v680_v0 = vld [vmem:[#allocation2] sm:$0xff]  ;;  %vm185_vm0 = vcmask 1040384   ;;  %vm142_vm3 = vcmask 7168   ;;  %v67_v45 = vld [vmem:[#allocation5] sm:$0xff] }
  0x32   :  { %124 = vadd.xlane.f32.xlu0 %v680_v0  ;;  %v183_v5 = vrot.slane %v680_v0, 7  ;;  %v165_v17 = vmul.f32 %v680_v0, %v680_v0  ;;  %v68_v46 = vld [vmem:[#allocation5 + $0x8] sm:$0xff]  ;;  %v458_v47 = vmul.f32 -1.442695, %v67_v45  ;;  %v69_v49 = vld [vmem:[#allocation5 + $0x10] sm:$0xff]  ;;  %v70_v51 = vld [vmem:[#allocation5 + $0x18] sm:$0xff] }
  0x33   :  { %v459_v48 = vmul.f32 -1.442695, %v68_v46  ;;  %v460_v50 = vmul.f32 -1.442695, %v69_v49  ;;  %v461_v52 = vmul.f32 -1.442695, %v70_v51 }
  0x34   :  { %v186_v6 = vsel %vm185_vm0, %v183_v5, 0.0  ;;  %v71_v53 = vld [vmem:[#allocation5 + $0x20] sm:$0xff]  ;;  %v74_v54 = vld [vmem:[#allocation5 + $0x38] sm:$0xff]  ;;  %v72_v56 = vld [vmem:[#allocation5 + $0x28] sm:$0xff]  ;;  %s640_s16 = smov 1.0   ;;  %vm278_vm4 = vcmask 850944  }
  0x35   :  { %v462_v55 = vmul.f32 -1.442695, %v71_v53  ;;  %v73_v57 = vld [vmem:[#allocation5 + $0x30] sm:$0xff]  ;;  %v465_v58 = vmul.f32 -1.442695, %v74_v54 }
  0x36   :  { %v463_v59 = vmul.f32 -1.442695, %v72_v56  ;;  %v464_v60 = vmul.f32 -1.442695, %v73_v57  ;;  %s641_s6 = smov 1e-16  }
  0xbb   :  { %v125_v1 = vpop.xlane.xlu0 %124 }
  0xbc   :  { %v127_v2 = vmul.f32 0.0078125, %v125_v1  ;;  %v154_v18 = vrot.slane %v125_v1, 4 }
  0xbe   :  { %v128_v3 = vsub.f32 %v680_v0, %v127_v2  ;;  %v155_v20 = vadd.f32 %v154_v18, %v125_v1 }
  0xc0   :  { %v129_v4 = vmul.f32 %v128_v3, %v128_v3  ;;  %v156_v24 = vrot.slane %v155_v20, 2 }
  0xc2   :  { %130 = vadd.xlane.f32.xlu0 %v129_v4  ;;  %v157_v29 = vadd.f32 %v156_v24, %v155_v20 }
  0xc4   :  { %v158_v34 = vrot.slane %v157_v29, 1 }
  0xc6   :  { %187 = vadd.xlane.f32.xlu0 %v186_v6  ;;  %v159_v40 = vadd.f32 %v158_v34, %v157_v29 }
 0x14b   :  { %v131_v7 = vpop.xlane.xlu0 %130 }
 0x14c   :  { %v132_v8 = vmul.f32 0.007874016, %v131_v7 }
 0x14e   :  { %498 = vrsqrt.f32 %v132_v8  ;;  %vm135_vm1 = vcmp.eq.f32.partialorder %v132_v8, inf  ;;  %v138_v11 = vand.u32 2147483648, %v132_v8  ;;  %vm137_vm2 = vcmp.eq.f32.partialorder %v132_v8, 0.0 }
 0x14f   :  { %v188_v19 = vpop.xlane.xlu0 %187  ;;  %500 = vpow2.f32 %v458_v47 }
 0x150   :  { %v189_v21 = vrot.slane %v188_v19, 4  ;;  %502 = vpow2.f32 %v459_v48 }
 0x151   :  { %504 = vpow2.f32 %v460_v50 }
 0x152   :  { %v190_v22 = vadd.f32 %v189_v21, %v188_v19  ;;  %506 = vpow2.f32 %v461_v52 }
 0x153   :  { %508 = vpow2.f32 %v462_v55 }
 0x154   :  { %v191_v27 = vrot.slane %v190_v22, 2  ;;  %510 = vpow2.f32 %v465_v58 }
 0x155   :  { %512 = vpow2.f32 %v463_v59  ;;  %v317_v59 = vlaneseq }
 0x156   :  { %v192_v35 = vadd.f32 %v191_v27, %v190_v22  ;;  %514 = vpow2.f32 %v464_v60 }
 0x157   :  { %v318_v60 = vshrl.u32 %v317_v59, 7 }
 0x158   :  { %v193_v41 = vrot.slane %v192_v35, 1 }
 0x15a   :  { %v194_v44 = vadd.f32 %v193_v41, %v192_v35 }
 0x15b   :  { %v499_v9 = vpop.eup %498 }
 0x15c   :  { %v134_v10 = vmul.f32 %v499_v9, %v132_v8  ;;  %v501_v61 = vpop.eup %500 }
 0x15d   :  { %v503_v62 = vpop.eup %502  ;;  %v99_v63 = vadd.f32 1.0, %v501_v61  ;;  %v306_v61 = vld [vmem:[#allocation7] sm:$0xf] }
 0x15e   :  { %v136_v12 = vsel %vm135_vm1, %v132_v8, %v134_v10  ;;  %v505_v1 = vpop.eup %504  ;;  %v100_v2 = vadd.f32 1.0, %v503_v62  ;;  %v315_v62 = vmul.f32 %v306_v61, %v306_v61 }
 0x15f   :  { %v139_v13 = vsel %vm137_vm2, %v138_v11, %v136_v12  ;;  %v101_v3 = vadd.f32 1.0, %v505_v1  ;;  %516 = vrcp.f32 %v99_v63  ;;  %v507_v4 = vpop.eup %506  ;;  %v319_v63 = vsub.s32 0, %v318_v60 }
 0x160   :  { %v140_v14 = vsub.f32 1.0, %v139_v13  ;;  %518 = vrcp.f32 %v100_v2  ;;  %v102_v5 = vadd.f32 1.0, %v507_v4  ;;  %v509_v6 = vpop.eup %508  ;;  %v323_v1 = vsub.s32 1, %v318_v60 }
 0x161   :  { %520 = vrcp.f32 %v101_v3  ;;  %v511_v7 = vpop.eup %510  ;;  %v103_v8 = vadd.f32 1.0, %v509_v6  ;;  %v320_v2 = vrot.slane %v315_v62, %v319_v63  ;;  %v327_v4 = vsub.s32 2, %v318_v60 }
 0x162   :  { %v141_v15 = vand.u32 2147483647, %v140_v14  ;;  %522 = vrcp.f32 %v102_v5  ;;  %v513_v9 = vpop.eup %512  ;;  %v106_v10 = vadd.f32 1.0, %v511_v7  ;;  %v324_v3 = vrot.slane %v315_v62, %v323_v1 }
 0x163   :  { %v515_v11 = vpop.eup %514  ;;  %v104_v12 = vadd.f32 1.0, %v513_v9  ;;  %524 = vrcp.f32 %v103_v8  ;;  %v331_v5 = vsub.s32 3, %v318_v60  ;;  %v328_v6 = vrot.slane %v315_v62, %v327_v4  ;;  %v311_v9 = vld [vmem:[#allocation8 + $0x20] sm:$0xff] }
 0x164   :  { %v143_v16 = vsel %vm142_vm3, %v141_v15, 0.0  ;;  %v105_v13 = vadd.f32 1.0, %v515_v11  ;;  %526 = vrcp.f32 %v106_v10  ;;  %v337_v7 = vsel %vm185_vm0, %v320_v2, 0.0  ;;  %v312_v10 = vld [vmem:[#allocation8 + $0x28] sm:$0xff] }
 0x165   :  { %144 = vadd.xlane.f32.xlu1 %v143_v16  ;;  %528 = vrcp.f32 %v104_v12  ;;  %v338_v8 = vsel %vm185_vm0, %v324_v3, 0.0  ;;  %v332_v11 = vrot.slane %v315_v62, %v331_v5 }
 0x166   :  { %530 = vrcp.f32 %v105_v13  ;;  %v339_v12 = vadd.f32 %v338_v8, %v337_v7  ;;  %v307_v13 = vld [vmem:[#allocation8] sm:$0xff] }
 0x169   :  { %166 = vadd.xlane.f32.xlu1 %v165_v17 }
 0x16c   :  { %v517_v16 = vpop.eup %516 }
 0x16d   :  { %v519_v18 = vpop.eup %518  ;;  %v264_v19 = vmul.f32 %v517_v16, %v517_v16 }
 0x16e   :  { %v521_v20 = vpop.eup %520  ;;  %v265_v22 = vmul.f32 %v519_v18, %v519_v18 }
 0x16f   :  { %v523_v24 = vpop.eup %522 }
 0x170   :  { %v267_v27 = vmul.f32 %v523_v24, %v523_v24 }
 0x1ee   :  { %v145_v23 = vpop.xlane.xlu1 %144 }
 0x1ef   :  { %v146_v25 = vrot.slane %v145_v23, 4 }
 0x1f1   :  { %v147_v26 = vadd.f32 %v146_v25, %v145_v23  ;;  %v266_v23 = vmul.f32 %v521_v20, %v521_v20 }
 0x1f2   :  { %v167_v28 = vpop.xlane.xlu1 %166 }
 0x1f3   :  { %v148_v30 = vrot.slane %v147_v26, 2  ;;  %v168_v31 = vrot.slane %v167_v28, 4 }
 0x1f5   :  { %v169_v32 = vadd.f32 %v168_v31, %v167_v28  ;;  %v149_v33 = vadd.f32 %v148_v30, %v147_v26  ;;  %v272_v26 = vadd.f32 %v265_v22, %v264_v19  ;;  %v525_v28 = vpop.eup %524  ;;  %v358_v19 = vmul.f32 %v311_v9, %v311_v9  ;;  %v313_v22 = vld [vmem:[#allocation8 + $0x30] sm:$0xff] }
 0x1f6   :  { %v268_v30 = vmul.f32 %v525_v28, %v525_v28  ;;  %v283_v35 = vmax.f32 %v517_v16, %v525_v28 }
 0x1f7   :  { %v170_v36 = vrot.slane %v169_v32, 2  ;;  %v150_v37 = vrot.slane %v149_v33, 1  ;;  %v273_v29 = vadd.f32 %v272_v26, %v266_v23  ;;  %v378_v23 = vrot.slane %v306_v61, %v319_v63 }
 0x1f9   :  { %v151_v38 = vadd.f32 %v150_v37, %v149_v33  ;;  %v171_v39 = vadd.f32 %v170_v36, %v169_v32  ;;  %v274_v33 = vadd.f32 %v273_v29, %v267_v27 }
 0x1fb   :  { %467 = vpush %v151_v38  ;;  %v172_v42 = vrot.slane %v171_v39, 1 }
 0x1fc   :  { %469 = vpush %v159_v40  ;;  %v275_v40 = vadd.f32 %v274_v33, %v268_v30 }
 0x1fd   :  { %v173_v43 = vadd.f32 %v172_v42, %v171_v39 }
 0x1ff   :  { %471 = vpush %v173_v43 }
 0x200   :  { %473 = vpush %v194_v44 }
 0x22c   :  { %s468_s2 = spop %467 }
 0x22d   :  { %s153_s3 = smul.f32 0.125, %s468_s2  ;;  %s470_s9 = spop %469 }
 0x22e   :  { %s163_s10 = smul.f32 0.0009765625, %s470_s9 }
 0x230   :  { %s164_s11 = sand.u32 2147483647, %s163_s10  ;;  %s472_s12 = spop %471 }
 0x231   :  { %s180_s13 = sadd.f32 %s164_s11, %s153_s3  ;;  %s177_s14 = smul.f32 0.0009765625, %s472_s12 }
 0x232   :  { %s474_s15 = spop %473  ;;  %s642_s12 = smov [#allocation10]  }
 0x233   :  { %s178_s17 = smax.f32 %s640_s16, %s177_s14  ;;  %s198_s18 = smul.f32 0.0078125, %s474_s15 }
 0x234   :  { %s179_s19 = smul.f32 4.0, %s178_s17 }
 0x235   :  { %v199_v14 = vstv %s198_s18 }
 0x236   :  { %s689_s20 = sadd.f32 %s180_s13, %s179_s19  ;;  %v692_v15 = vsub.f32 %v680_v0, %v199_v14  ;;  %v527_v0 = vpop.eup %526  ;;  %v308_v14 = vld [vmem:[#allocation8 + $0x8] sm:$0xff] }
 0x237   :  { %v529_v31 = vpop.eup %528  ;;  %v286_v32 = vsel %vm278_vm4, %v527_v0, -inf  ;;  %v271_v44 = vmul.f32 %v527_v0, %v527_v0  ;;  %v355_v26 = vmul.f32 %v308_v14, %v308_v14  ;;  %v309_v0 = vld [vmem:[#allocation8 + $0x10] sm:$0xff] }
 0x238   :  { %v201_v17 = vmul.f32 %v692_v15, %v692_v15  ;;  %v531_v34 = vpop.eup %530  ;;  %v284_v36 = vmax.f32 %v519_v18, %v529_v31  ;;  %v287_v37 = vmax.f32 %v523_v24, %v286_v32  ;;  %v269_v38 = vmul.f32 %v529_v31, %v529_v31 }
 0x239   :  { %v285_v39 = vmax.f32 %v521_v20, %v531_v34  ;;  %v270_v42 = vmul.f32 %v531_v34, %v531_v34  ;;  %v279_v48 = vsel %vm278_vm4, %v271_v44, 0.0  ;;  %v340_v18 = vsel %vm185_vm0, %v328_v6, 0.0 }
 0x23a   :  { %v203_v21 = vrot.slane %v201_v17, 7  ;;  %v288_v41 = vmax.f32 %v283_v35, %v284_v36  ;;  %v276_v45 = vadd.f32 %v275_v40, %v269_v38  ;;  %v359_v20 = vmul.f32 %v312_v10, %v312_v10  ;;  %v310_v38 = vld [vmem:[#allocation8 + $0x18] sm:$0xff] }
 0x23b   :  { %v289_v43 = vmax.f32 %v285_v39, %v287_v37  ;;  %v382_v24 = vrot.slane %v306_v61, %v323_v1  ;;  %v341_v29 = vadd.f32 %v340_v18, %v339_v12  ;;  %v342_v31 = vsel %vm185_vm0, %v332_v11, 0.0  ;;  %v314_v37 = vld [vmem:[#allocation8 + $0x38] sm:$0xff] }
 0x23c   :  { %v205_v25 = vsel %vm185_vm0, %v203_v21, 0.0  ;;  %v277_v47 = vadd.f32 %v276_v45, %v270_v42  ;;  %v360_v32 = vmul.f32 %v313_v22, %v313_v22  ;;  %v367_v33 = vadd.f32 %v359_v20, %v358_v19 }
 0x23d   :  { %206 = vadd.xlane.f32.xlu1 %v205_v25  ;;  %v290_v46 = vmax.f32 %v288_v41, %v289_v43  ;;  %v354_v25 = vmul.f32 %v307_v13, %v307_v13  ;;  %v386_v34 = vrot.slane %v306_v61, %v327_v4  ;;  %v400_v39 = vmul.f32 %v382_v24, %v312_v10 }
 0x23e   :  { %v280_v49 = vadd.f32 %v279_v48, %v277_v47  ;;  %v356_v40 = vmul.f32 %v309_v0, %v309_v0  ;;  %v395_v42 = vmul.f32 %v378_v23, %v307_v13  ;;  %v396_v43 = vmul.f32 %v382_v24, %v308_v14 }
 0x23f   :  { %291 = vmax.xlane.f32.xlu0 %v290_v46  ;;  %v362_v41 = vadd.f32 %v355_v26, %v354_v25  ;;  %v343_v47 = vadd.f32 %v342_v31, %v341_v29  ;;  %v361_v48 = vmul.f32 %v314_v37, %v314_v37 }
 0x241   :  { %281 = vadd.xlane.f32.xlu1 %v280_v49  ;;  %v368_v49 = vadd.f32 %v367_v33, %v360_v32 }
 0x243   :  { %v369_v60 = vadd.f32 %v368_v49, %v361_v48 }
 0x2c6   :  { %v207_v50 = vpop.xlane.xlu1 %206 }
 0x2c7   :  { %v208_v51 = vrot.slane %v207_v50, 4 }
 0x2c8   :  { %v292_v17 = vpop.xlane.xlu0 %291 }
 0x2c9   :  { %v209_v52 = vadd.f32 %v208_v51, %v207_v50  ;;  %v293_v28 = vmul.f32 %v292_v17, %v292_v17  ;;  %v357_v50 = vmul.f32 %v310_v38, %v310_v38  ;;  %v390_v51 = vrot.slane %v306_v61, %v331_v5 }
 0x2ca   :  { %v282_v30 = vpop.xlane.xlu1 %281 }
 0x2cb   :  { %v210_v53 = vrot.slane %v209_v52, 2  ;;  %v294_v46 = vsub.f32 %v282_v30, %v293_v28  ;;  %v402_v62 = vmul.f32 %v390_v51, %v314_v37  ;;  %v398_v63 = vmul.f32 %v390_v51, %v310_v38 }
 0x2cd   :  { %v211_v54 = vadd.f32 %v210_v53, %v209_v52  ;;  %v295_v59 = vsel %vm142_vm3, %v294_v46, 0.0 }
 0x2cf   :  { %v212_v55 = vrot.slane %v211_v54, 1 }
 0x2d1   :  { %v213_v56 = vadd.f32 %v212_v55, %v211_v54  ;;  %v401_v54 = vmul.f32 %v386_v34, %v313_v22 }
 0x2d3   :  { %475 = vpush %v213_v56  ;;  %v363_v56 = vadd.f32 %v362_v41, %v356_v40 }
 0x2d5   :  { %v364_v1 = vadd.f32 %v363_v56, %v357_v50 }
 0x304   :  { %s476_s21 = spop %475 }
 0x305   :  { %s217_s22 = smul.f32 0.0078125, %s476_s21 }
 0x307   :  { %v218_v57 = vstv %s217_s22 }
 0x308   :  { %532 = vrsqrt.f32 %v218_v57  ;;  %v397_v57 = vmul.f32 %v386_v34, %v309_v0 }
 0x315   :  { %v533_v58 = vpop.eup %532 }
 0x316   :  { %477 = vpush %v533_v58  ;;  %v403_v58 = vadd.f32 %v396_v43, %v395_v42 }
 0x318   :  { %v404_v2 = vadd.f32 %v403_v58, %v397_v57 }
 0x31a   :  { %v405_v4 = vadd.f32 %v404_v2, %v398_v63 }
 0x347   :  { %s478_s23 = spop %477 }
 0x348   :  { %v221_v16 = vstv %s478_s23 }
 0x349   :  { %v222_v21 = vmul.f32 %v221_v16, %v692_v15  ;;  %v399_v15 = vmul.f32 %v378_v23, %v311_v9 }
 0x34b   :  { %v223_v27 = vmul.f32 %v222_v21, %v222_v21  ;;  %v408_v55 = vadd.f32 %v400_v39, %v399_v15 }
 0x34d   :  { %v224_v35 = vmul.f32 %v223_v27, %v222_v21  ;;  %v225_v36 = vmul.f32 %v223_v27, %v223_v27  ;;  %v409_v61 = vadd.f32 %v408_v55, %v401_v54 }
 0x34f   :  { %v227_v44 = vrot.slane %v224_v35, 7  ;;  %v243_v45 = vrot.slane %v225_v36, 7  ;;  %v410_v3 = vadd.f32 %v409_v61, %v402_v62 }
 0x351   :  { %v229_v52 = vsel %vm185_vm0, %v227_v44, 0.0  ;;  %v245_v53 = vsel %vm185_vm0, %v243_v45, 0.0 }
 0x352   :  { %230 = vadd.xlane.f32.xlu0 %v229_v52  ;;  %246 = vadd.xlane.f32.xlu1 %v245_v53 }
 0x356   :  { %344 = vadd.xlane.f32.xlu1 %v343_v47  ;;  %296 = vadd.xlane.f32.xlu0 %v295_v59 }
 0x35a   :  { %370 = vadd.xlane.f32.xlu1 %v369_v60  ;;  %365 = vadd.xlane.f32.xlu0 %v364_v1 }
 0x35e   :  { %411 = vadd.xlane.f32.xlu1 %v410_v3  ;;  %406 = vadd.xlane.f32.xlu0 %v405_v4 }
 0x3db   :  { %v231_v5 = vpop.xlane.xlu0 %230  ;;  %v247_v6 = vpop.xlane.xlu1 %246 }
 0x3dc   :  { %v232_v7 = vrot.slane %v231_v5, 4  ;;  %v248_v8 = vrot.slane %v247_v6, 4 }
 0x3de   :  { %v233_v9 = vadd.f32 %v232_v7, %v231_v5  ;;  %v249_v10 = vadd.f32 %v248_v8, %v247_v6 }
 0x3df   :  { %v297_v11 = vpop.xlane.xlu0 %296  ;;  %v345_v12 = vpop.xlane.xlu1 %344 }
 0x3e0   :  { %v234_v13 = vrot.slane %v233_v9, 2  ;;  %v250_v14 = vrot.slane %v249_v10, 2  ;;  %v298_v16 = vrot.slane %v297_v11, 4  ;;  %v346_v17 = vrot.slane %v345_v12, 4 }
 0x3e2   :  { %v299_v18 = vadd.f32 %v298_v16, %v297_v11  ;;  %v347_v19 = vadd.f32 %v346_v17, %v345_v12  ;;  %v235_v20 = vadd.f32 %v234_v13, %v233_v9  ;;  %v251_v21 = vadd.f32 %v250_v14, %v249_v10 }
 0x3e3   :  { %v366_v33 = vpop.xlane.xlu0 %365  ;;  %v371_v34 = vpop.xlane.xlu1 %370 }
 0x3e4   :  { %v300_v22 = vrot.slane %v299_v18, 2  ;;  %v348_v23 = vrot.slane %v347_v19, 2  ;;  %v236_v24 = vrot.slane %v235_v20, 1  ;;  %v252_v25 = vrot.slane %v251_v21, 1 }
 0x3e5   :  { %v372_v35 = vmax.f32 %v366_v33, 1e-16  ;;  %v373_v36 = vmax.f32 %v371_v34, 1e-16 }
 0x3e6   :  { %v237_v26 = vadd.f32 %v236_v24, %v235_v20  ;;  %v253_v27 = vadd.f32 %v252_v25, %v251_v21  ;;  %v301_v28 = vadd.f32 %v300_v22, %v299_v18  ;;  %v349_v29 = vadd.f32 %v348_v23, %v347_v19 }
 0x3e7   :  { %v407_v39 = vpop.xlane.xlu0 %406  ;;  %v412_v40 = vpop.xlane.xlu1 %411 }
 0x3e8   :  { %479 = vpush %v237_v26  ;;  %v302_v0 = vrot.slane %v301_v28, 1  ;;  %v350_v30 = vrot.slane %v349_v29, 1 }
 0x3e9   :  { %481 = vpush %v253_v27 }
 0x3ea   :  { %v303_v31 = vadd.f32 %v302_v0, %v301_v28  ;;  %v351_v32 = vadd.f32 %v350_v30, %v349_v29 }
 0x3ec   :  { %483 = vpush %v303_v31 }
 0x3ed   :  { %485 = vpush %v351_v32 }
 0x419   :  { %s480_s24 = spop %479 }
 0x41a   :  { %s241_s25 = smul.f32 0.0078125, %s480_s24  ;;  %s482_s26 = spop %481 }
 0x41b   :  { %s257_s27 = smul.f32 0.0078125, %s482_s26 }
 0x41c   :  { %s260_s28 = sand.u32 2147483647, %s241_s25 }
 0x41d   :  { %s466_s29 = sadd.f32 -3.0, %s257_s27  ;;  %s484_s1 = spop %483 }
 0x41e   :  { %s305_s30 = smul.f32 0.3128128, %s484_s1  ;;  %s486_s5 = spop %485 }
 0x41f   :  { %s259_s0 = sand.u32 2147483647, %s466_s29  ;;  %s353_s7 = smax.f32 %s641_s6, %s486_s5 }
 0x420   :  { %s261_s8 = sadd.f32 %s260_s28, %s259_s0  ;;  %v413_v37 = vstv %s353_s7 }
 0x421   :  { %439 = sst [smem:[#allocation10 + $0x1]] %s305_s30  ;;  %v414_v38 = vmul.f32 %v413_v37, %v372_v35  ;;  %v415_v15 = vmul.f32 %v413_v37, %v373_v36 }
 0x422   :  { %s262_s2 = smul.f32 0.125, %s261_s8 }
 0x423   :  { %534 = vrsqrt.f32 %v414_v38 }
 0x424   :  { %s263_s3 = sadd.f32 %s262_s2, %s689_s20  ;;  %536 = vrsqrt.f32 %v415_v15 }
 0x426   :  { %437 = sst [smem:[#allocation10]] %s263_s3 }
 0x430   :  { %v535_v41 = vpop.eup %534 }
 0x431   :  { %v537_v42 = vpop.eup %536  ;;  %v418_v43 = vmul.f32 %v535_v41, %v407_v39 }
 0x432   :  { %v419_v44 = vmul.f32 %v537_v42, %v412_v40 }
 0x433   :  { %v420_v45 = vsel %vm142_vm3, %v418_v43, 0.0 }
 0x434   :  { %v421_v46 = vsel %vm142_vm3, %v419_v44, 0.0 }
 0x435   :  { %v422_v47 = vadd.f32 %v421_v46, %v420_v45 }
 0x437   :  { %423 = vadd.xlane.f32.xlu0 %v422_v47 }
 0x4c0   :  { %v424_v48 = vpop.xlane.xlu0 %423 }
 0x4c1   :  { %v425_v49 = vrot.slane %v424_v48, 4 }
 0x4c3   :  { %v426_v50 = vadd.f32 %v425_v49, %v424_v48 }
 0x4c5   :  { %v427_v51 = vrot.slane %v426_v50, 2 }
 0x4c7   :  { %v428_v52 = vadd.f32 %v427_v51, %v426_v50 }
 0x4c9   :  { %v429_v53 = vrot.slane %v428_v52, 1 }
 0x4cb   :  { %v430_v54 = vadd.f32 %v429_v53, %v428_v52 }
 0x4cd   :  { %487 = vpush %v430_v54 }
 0x4fe   :  { %s488_s9 = spop %487 }
 0x4ff   :  { %s434_s10 = smul.f32 0.0625, %s488_s9 }
 0x501   :  { %s435_s11 = smul.f32 -100.0, %s434_s10 }
 0x503   :  { %441 = sst [smem:[#allocation10 + $0x2]] %s435_s11 }
 0x504   :  { %449 = dma.smem_to_hbm %s642_s12, 16, %s717_s4, [#allocation4]  }
 0x505   :  { %632 = dma.done.wait [#allocation4], 16  }
 0x506   :  { %633 = vsyncadd [#allocation4], 4294967280 }
 0x507   :  { %453 = sfence }
 0x508   :  { %454 = vsyncpa [#allocation3], 1 }
 0x509   :  { %455 = vsyncpa [#allocation6], 1 }
 0x50a   :  { %456 = vsyncpa [#allocation9], 1 }
 0x50b   :  { %457 = vsyncpa [#allocation4], 1 }

</bundles_post_ra>
